<compile_context>
chip_gen: v7x
topology: tpu7x:2x2x1
jax: 0.10.0
libtpu: 0.0.40
codegen_flags: <defaults>
</compile_context>

<pallas_src>
import math

import numpy as np
import jax
import jax.numpy as jnp
from jax.experimental import pallas as pl
from jax.experimental.pallas import tpu as pltpu

# ----------------------------- model constants -----------------------------
# 28x28 input is implied by fc = Linear(32*4*4, 128).
H0 = 28
OC1, K1 = 16, 7
H1 = H0 - K1 + 1          # 22   conv1 output spatial
P1 = H1 // 2              # 11   pool1 output spatial
OC2, K2 = 32, 3
H2 = P1 - K2 + 1          # 9    conv2 output spatial
P2 = H2 // 2              # 4    pool2 output spatial (floor -> row/col 8 unused)
H2P = 2 * P2              # 8    conv2 rows actually consumed by pool2
NCLS = 10
FEAT = 128

KK1 = K1 * H0             # 196  fat contraction dim for conv1 (7 rows x 28 cols)
L1P = P1 * OC1            # 176  pooled conv1 lane width (lane = jp*16 + oc)
L2P = P2 * OC2            # 128  pooled conv2 lane width (lane = jp2*32 + oc)
FCK = P2 * L2P            # 512  fc contraction dim


# ----------------------------- Pallas kernels ------------------------------

def gabor_weight_kernel(th_ref, fr_ref, sg_ref, ps_ref, gx_ref, gy_ref, w_ref):
    """Build the 16 Gabor filters. params are [OC,1], grids are [1,KH*KW]."""
    th = th_ref[...]
    fr = fr_ref[...]
    sg = sg_ref[...]
    ps = ps_ref[...]
    gx = gx_ref[...]
    gy = gy_ref[...]
    rot_x = gx * jnp.cos(th) + gy * jnp.sin(th)            # [OC, KK]
    rot_y = -gx * jnp.sin(th) + gy * jnp.cos(th)
    g = jnp.exp(-0.5 * (rot_x * rot_x + rot_y * rot_y) / (sg * sg)) * \
        jnp.cos(2.0 * jnp.pi * fr * rot_x + ps)
    g = g - jnp.mean(g, axis=1, keepdims=True)             # per-filter zero mean
    w_ref[...] = g


def _make_fused_kernel(bt):
    """Whole forward for a tile of `bt` images, entirely in VMEM."""

    def kernel(x_ref, t1e_ref, t1o_ref, b1_ref, t2c_ref, b2_ref,
               wfc_ref, bfc_ref, wh_ref, bh_ref, out_ref):
        f32 = jnp.float32

        # --- conv1 (7x7, 1->16) + ReLU, one fat-K matmul per output-column
        #     parity.  x_ref is H-im2col'ed: lane = di*28 + w, rows = (i, b).
        xc = x_ref[...].reshape(H1 * bt, KK1)                       # [22*bt, 196]
        b1 = b1_ref[...]
        y1e = jnp.maximum(
            jnp.dot(xc, t1e_ref[...], preferred_element_type=f32) + b1, 0.0)
        y1o = jnp.maximum(
            jnp.dot(xc, t1o_ref[...], preferred_element_type=f32) + b1, 0.0)

        # --- maxpool1 2x2: W-max = elementwise max of even/odd column outputs,
        #     H-max = sublane-half max after an 8-aligned row regroup.
        ym = jnp.maximum(y1e, y1o).reshape(P1, 2 * bt, L1P)
        p1 = jnp.maximum(ym[:, :bt, :], ym[:, bt:, :])              # [P1, bt, 176]

        # --- conv2 (3x3, 16->32) as 3 banded matmuls over kernel rows; the
        #     even/odd output columns are packed side by side on lanes (N=256)
        #     and the unused 9th row/column (floor pooling) is never computed.
        y2 = None
        for di in range(K2):
            lhs = p1[di:di + H2P].reshape(H2P * bt, L1P)            # [8*bt, 176]
            d = jnp.dot(lhs, t2c_ref[di], preferred_element_type=f32)
            y2 = d if y2 is None else y2 + d
        y2 = jnp.maximum(y2 + b2_ref[...], 0.0)                     # [8*bt, 256]

        # --- maxpool2 2x2: W-max = aligned lane-half max, H-max = sublane max.
        m2 = jnp.maximum(y2[:, :L2P], y2[:, L2P:]).reshape(P2, 2 * bt, L2P)
        p2 = jnp.maximum(m2[:, :bt, :], m2[:, bt:, :])              # [P2, bt, 128]

        # --- fc (512 -> 128): 128-aligned lane concat -> single matmul -> ReLU
        pc = jnp.concatenate([p2[i] for i in range(P2)], axis=1)    # [bt, 512]
        feats = jnp.maximum(
            jnp.dot(pc, wfc_ref[...], preferred_element_type=f32) + bfc_ref[...],
            0.0)

        # --- head (128 -> 10, zero-padded to 128 lanes => dense HBM store)
        out_ref[...] = jnp.dot(feats, wh_ref[...],
                               preferred_element_type=f32) + bh_ref[...]

    return kernel


# ----------------------------- wrappers -------------------------------------

def pallas_gabor_weights(thetas, freqs, sigmas, psis, gx, gy):
    vmem = pl.BlockSpec(memory_space=pltpu.MemorySpace.VMEM)
    oc = thetas.shape[0]
    kk = gx.size
    return pl.pallas_call(
        gabor_weight_kernel,
        out_shape=jax.ShapeDtypeStruct((oc, kk), jnp.float32),
        in_specs=[vmem] * 6,
        out_specs=vmem,
    )(thetas.reshape(oc, 1), freqs.reshape(oc, 1), sigmas.reshape(oc, 1),
      psis.reshape(oc, 1), gx.reshape(1, kk), gy.reshape(1, kk))


def fused_forward(xim, packed, bt):
    bp = xim.shape[1]
    grid = (bp // bt,)

    def const_spec(shape):
        return pl.BlockSpec(shape, lambda i, _n=len(shape): (0,) * _n)

    in_specs = [
        pl.BlockSpec((H1, bt, KK1), lambda i: (0, i, 0)),    # x (H-im2col) tile
        const_spec((KK1, L1P)),                              # t1 even columns
        const_spec((KK1, L1P)),                              # t1 odd  columns
        const_spec((1, L1P)),                                # conv1 bias (tiled)
        const_spec((K2, L1P, 2 * L2P)),                      # t2 even|odd columns
        const_spec((1, 2 * L2P)),                            # conv2 bias (tiled)
        const_spec((FCK, FEAT)),                             # fc weight
        const_spec((1, FEAT)),                               # fc bias
        const_spec((FEAT, FEAT)),                            # head weight (padded)
        const_spec((1, FEAT)),                               # head bias (padded)
    ]
    out_specs = pl.BlockSpec((bt, FEAT), lambda i: (i, 0))

    return pl.pallas_call(
        _make_fused_kernel(bt),
        out_shape=jax.ShapeDtypeStruct((bp, FEAT), jnp.float32),
        grid_spec=pltpu.PrefetchScalarGridSpec(
            num_scalar_prefetch=0,
            grid=grid,
            in_specs=in_specs,
            out_specs=out_specs,
        ),
        compiler_params=pltpu.CompilerParams(
            dimension_semantics=("parallel",),
            vmem_limit_bytes=48 * 1024 * 1024,
        ),
    )(xim, packed["t1e"], packed["t1o"], packed["b1t"],
      packed["t2c"], packed["b2t"],
      packed["wfc"], packed["bfc"], packed["whp"], packed["bhp"])


# ------------------- weight preprocessing (layout plumbing) -----------------

def _band_conv1_split(w1, parity):
    """Banded conv1 operator for output columns j = 2*jp + parity.

    T[di*28 + w, jp*16 + oc] = w1[oc, di*7 + dj]  with  w = 2*jp + parity + dj.
    """
    di, jp, dj, oc = np.meshgrid(np.arange(K1), np.arange(P1), np.arange(K1),
                                 np.arange(OC1), indexing="ij")
    rows = di * H0 + 2 * jp + parity + dj
    cols = jp * OC1 + oc
    return jnp.zeros((KK1, L1P), jnp.float32).at[rows, cols].set(
        w1[oc, di * K1 + dj])


def _band_conv2_split(w2, parity):
    """Banded conv2 operator for output columns j2 = 2*jp2 + parity.

    T[di, (2*jp2 + parity + dj)*16 + c, jp2*32 + oc] = w2[oc, c, di, dj].
    """
    di, jp2, dj, c, oc = np.meshgrid(np.arange(K2), np.arange(P2), np.arange(K2),
                                     np.arange(OC1), np.arange(OC2), indexing="ij")
    rows = (2 * jp2 + parity + dj) * OC1 + c
    cols = jp2 * OC2 + oc
    return jnp.zeros((K2, L1P, L2P), jnp.float32).at[di, rows, cols].set(
        w2[oc, c, di, dj])


def pack_params(p):
    """One-time weight packing (incl. Gabor bank build) - not in the hot path."""
    f32 = jnp.float32
    # Gabor bank built on-device by the small Pallas kernel, hoisted out of the
    # per-forward path (parameters are fixed for this forward-only kernel).
    w1 = pallas_gabor_weights(p["thetas"], p["freqs"], p["sigmas"], p["psis"],
                              p["grid_x"], p["grid_y"])

    t2c = jnp.concatenate([_band_conv2_split(p["conv2_w"], 0),
                           _band_conv2_split(p["conv2_w"], 1)], axis=2)

    # fc weight -> row index i*128 + jp2*32 + oc matching the kernel's pcat lanes
    wfc = jnp.transpose(p["fc_w"].reshape(FEAT, OC2, P2, P2),
                        (2, 3, 1, 0)).reshape(FCK, FEAT)

    # head padded to 128 output lanes for a dense store
    whp = jnp.zeros((FEAT, FEAT), f32).at[:, :NCLS].set(p["head_w"].T)
    bhp = jnp.zeros((1, FEAT), f32).at[0, :NCLS].set(p["head_b"])

    return dict(
        t1e=_band_conv1_split(w1, 0),
        t1o=_band_conv1_split(w1, 1),
        b1t=jnp.tile(p["gabor_b"], P1).reshape(1, L1P),
        t2c=t2c,
        b2t=jnp.tile(p["conv2_b"], 2 * P2).reshape(1, 2 * L2P),
        wfc=wfc, bfc=p["fc_b"].reshape(1, FEAT),
        whp=whp, bhp=bhp,
    )


# ----------------------------- model ----------------------------------------

def init_params(key):
    p = {}
    oc = OC1
    # TrainableGaborConv2d(1, 16, 7) parameters
    p["thetas"] = jnp.linspace(0.0, jnp.pi - jnp.pi / oc, oc, dtype=jnp.float32)
    p["freqs"] = jnp.array([0.15, 0.3] * (oc // 2), dtype=jnp.float32)
    p["sigmas"] = jnp.full((oc,), 7.0 / 4.5, dtype=jnp.float32)
    p["psis"] = jnp.zeros((oc,), dtype=jnp.float32)
    xs = jnp.linspace(-3.0, 3.0, 7, dtype=jnp.float32)
    p["grid_x"] = jnp.tile(xs[None, :], (7, 1))            # grid_x[r, c] = xs[c]
    p["grid_y"] = jnp.tile(xs[:, None], (1, 7))            # grid_y[r, c] = xs[r]

    keys = jax.random.split(key, 7)
    b1 = 1.0 / math.sqrt(1 * 7 * 7)
    p["gabor_b"] = jax.random.uniform(keys[0], (16,), jnp.float32, -b1, b1)

    b2 = 1.0 / math.sqrt(16 * 3 * 3)
    p["conv2_w"] = jax.random.uniform(keys[1], (32, 16, 3, 3), jnp.float32, -b2, b2)
    p["conv2_b"] = jax.random.uniform(keys[2], (32,), jnp.float32, -b2, b2)

    bfc = 1.0 / math.sqrt(512)
    p["fc_w"] = jax.random.uniform(keys[3], (128, 512), jnp.float32, -bfc, bfc)
    p["fc_b"] = jax.random.uniform(keys[4], (128,), jnp.float32, -bfc, bfc)

    bh = 1.0 / math.sqrt(128)
    p["head_w"] = jax.random.uniform(keys[5], (10, 128), jnp.float32, -bh, bh)
    p["head_b"] = jax.random.uniform(keys[6], (10,), jnp.float32, -bh, bh)
    return p


def _pick_bt(b):
    """Largest batch tile <=128 keeping >=2 grid steps (v7x has 2 TensorCores)."""
    bt = ((-(-b // 2) + 7) // 8) * 8
    return max(8, min(128, bt))


def gabor_classifier_forward(x, packed):
    """x: NCHW [B, 1, 28, 28] float32 -> logits [B, 10]."""
    b = x.shape[0]
    bt = _pick_bt(b)
    bp = -(-b // bt) * bt

    # Wrapper-side H-direction im2col + batch-on-sublanes packing:
    #   xim[i, n, di*28 + w] = x[n, 0, i+di, w]
    # so conv1 inside the kernel is a single fat-K (196) matmul per parity.
    x2 = x.reshape(b, H0, H0)
    xim = jnp.stack([x2[:, di:di + H1, :] for di in range(K1)], axis=2)  # [B,22,7,28]
    xim = jnp.transpose(xim, (1, 0, 2, 3)).reshape(H1, b, KK1)           # [22,B,196]
    if bp != b:
        xim = jnp.pad(xim, ((0, 0), (0, bp - b), (0, 0)))

    out = fused_forward(xim, packed, bt)
    return out[:b, :NCLS]


# ----------------------------- main ------------------------------------------

if __name__ == "__main__":
    key = jax.random.PRNGKey(0)
    pkey, xkey = jax.random.split(key)
    params = init_params(pkey)
    packed = pack_params(params)      # weight packing + Gabor bank, done once
    # 28x28 fixed by fc = Linear(32*4*4, 128); B=256 -> BT=128, grid of 2
    # "parallel" steps (keeps both v7x TensorCores busy, 1 fat step per core).
    x = jax.random.normal(xkey, (256, 1, 28, 28), dtype=jnp.float32)

    fwd = jax.jit(gabor_classifier_forward)
    logits = fwd(x, packed)
    jax.block_until_ready(logits)
    assert logits.shape == (256, 10) and logits.dtype == jnp.float32
    print("KERNEL_OK")
</pallas_src>

<mosaic_0001>
module attributes {stable_mosaic.version = 11 : i64} {
  func.func @gabor_weight_kernel(%arg0: memref<16x1xf32, #tpu.memory_space<vmem>>, %arg1: memref<16x1xf32, #tpu.memory_space<vmem>>, %arg2: memref<16x1xf32, #tpu.memory_space<vmem>>, %arg3: memref<16x1xf32, #tpu.memory_space<vmem>>, %arg4: memref<1x49xf32, #tpu.memory_space<vmem>>, %arg5: memref<1x49xf32, #tpu.memory_space<vmem>>, %arg6: memref<16x49xf32, #tpu.memory_space<vmem>>) attributes {dimension_semantics = [], scalar_prefetch = 0 : i64, scratch_operands = 0 : i64, tpu.core_type = #tpu.core_type<tc>} {
    %c0 = arith.constant 0 : index
    %c0_0 = arith.constant 0 : index
    %0 = vector.load %arg0[%c0, %c0_0] : memref<16x1xf32, #tpu.memory_space<vmem>>, vector<16x1xf32>
    %c0_1 = arith.constant 0 : index
    %c0_2 = arith.constant 0 : index
    %1 = vector.load %arg1[%c0_1, %c0_2] : memref<16x1xf32, #tpu.memory_space<vmem>>, vector<16x1xf32>
    %c0_3 = arith.constant 0 : index
    %c0_4 = arith.constant 0 : index
    %2 = vector.load %arg2[%c0_3, %c0_4] : memref<16x1xf32, #tpu.memory_space<vmem>>, vector<16x1xf32>
    %c0_5 = arith.constant 0 : index
    %c0_6 = arith.constant 0 : index
    %3 = vector.load %arg3[%c0_5, %c0_6] : memref<16x1xf32, #tpu.memory_space<vmem>>, vector<16x1xf32>
    %c0_7 = arith.constant 0 : index
    %c0_8 = arith.constant 0 : index
    %4 = vector.load %arg4[%c0_7, %c0_8] : memref<1x49xf32, #tpu.memory_space<vmem>>, vector<1x49xf32>
    %c0_9 = arith.constant 0 : index
    %c0_10 = arith.constant 0 : index
    %5 = vector.load %arg5[%c0_9, %c0_10] : memref<1x49xf32, #tpu.memory_space<vmem>>, vector<1x49xf32>
    %6 = math.cos %0 : vector<16x1xf32>
    %7 = vector.broadcast %4 : vector<1x49xf32> to vector<16x49xf32>
    %8 = vector.broadcast %6 : vector<16x1xf32> to vector<16x49xf32>
    %9 = arith.mulf %7, %8 : vector<16x49xf32>
    %10 = math.sin %0 : vector<16x1xf32>
    %11 = vector.broadcast %5 : vector<1x49xf32> to vector<16x49xf32>
    %12 = vector.broadcast %10 : vector<16x1xf32> to vector<16x49xf32>
    %13 = arith.mulf %11, %12 : vector<16x49xf32>
    %14 = arith.addf %9, %13 : vector<16x49xf32>
    %cst = arith.constant 0.000000e+00 : f32
    %15 = vector.broadcast %cst : f32 to vector<1x49xf32>
    %16 = arith.subf %15, %4 : vector<1x49xf32>
    %17 = math.sin %0 : vector<16x1xf32>
    %18 = vector.broadcast %16 : vector<1x49xf32> to vector<16x49xf32>
    %19 = vector.broadcast %17 : vector<16x1xf32> to vector<16x49xf32>
    %20 = arith.mulf %18, %19 : vector<16x49xf32>
    %21 = math.cos %0 : vector<16x1xf32>
    %22 = vector.broadcast %5 : vector<1x49xf32> to vector<16x49xf32>
    %23 = vector.broadcast %21 : vector<16x1xf32> to vector<16x49xf32>
    %24 = arith.mulf %22, %23 : vector<16x49xf32>
    %25 = arith.addf %20, %24 : vector<16x49xf32>
    %26 = arith.mulf %14, %14 : vector<16x49xf32>
    %27 = arith.mulf %25, %25 : vector<16x49xf32>
    %28 = arith.addf %26, %27 : vector<16x49xf32>
    %cst_11 = arith.constant -5.000000e-01 : f32
    %29 = vector.broadcast %cst_11 : f32 to vector<16x49xf32>
    %30 = arith.mulf %29, %28 : vector<16x49xf32>
    %31 = arith.mulf %2, %2 : vector<16x1xf32>
    %32 = vector.broadcast %31 : vector<16x1xf32> to vector<16x49xf32>
    %33 = arith.divf %30, %32 : vector<16x49xf32>
    %34 = math.exp %33 : vector<16x49xf32>
    %cst_12 = arith.constant 6.28318548 : f32
    %35 = vector.broadcast %cst_12 : f32 to vector<16x1xf32>
    %36 = arith.mulf %35, %1 : vector<16x1xf32>
    %37 = vector.broadcast %36 : vector<16x1xf32> to vector<16x49xf32>
    %38 = arith.mulf %37, %14 : vector<16x49xf32>
    %39 = vector.broadcast %3 : vector<16x1xf32> to vector<16x49xf32>
    %40 = arith.addf %38, %39 : vector<16x49xf32>
    %41 = math.cos %40 : vector<16x49xf32>
    %42 = arith.mulf %34, %41 : vector<16x49xf32>
    %cst_13 = arith.constant dense<0.000000e+00> : vector<16xf32>
    %43 = vector.multi_reduction <add>, %42, %cst_13 [1] : vector<16x49xf32> to vector<16xf32>
    %44 = vector.shape_cast %43 : vector<16xf32> to vector<16x1xf32>
    %cst_14 = arith.constant 4.900000e+01 : f32
    %45 = vector.broadcast %cst_14 : f32 to vector<16x1xf32>
    %46 = arith.divf %44, %45 : vector<16x1xf32>
    %47 = vector.broadcast %46 : vector<16x1xf32> to vector<16x49xf32>
    %48 = arith.subf %42, %47 : vector<16x49xf32>
    %c0_15 = arith.constant 0 : index
    %c0_16 = arith.constant 0 : index
    %49 = vector.load %arg6[%c0_15, %c0_16] : memref<16x49xf32, #tpu.memory_space<vmem>>, vector<16x49xf32>
    tpu.vector_store %arg6[%c0_15, %c0_16], %48 {strides = array<i32>} : memref<16x49xf32, #tpu.memory_space<vmem>>, vector<16x49xf32>,
    return
  }
}

</mosaic_0001>

<bundles_post_ra>
// kernel: tpu_custom_call.1
= control target key start
LH: loop header
LB: loop body
LE: loop exit
PB: predicated region body
PF: predicated region fallthrough
CT: control target
= control target key end

     0   :  { %v892_v1 = vmov 0   ;;  %s1186_s0 = inlined_call_operand.vmem [shape: f32[16,1], index: 0, kind: input, shape index: {}]   ;;  %s1187_s1 = inlined_call_operand.vmem [shape: f32[16,1], index: 1, kind: input, shape index: {}]   ;;  %s1188_s2 = inlined_call_operand.vmem [shape: f32[16,1], index: 2, kind: input, shape index: {}]   ;;  %s1189_s3 = inlined_call_operand.vmem [shape: f32[16,1], index: 3, kind: input, shape index: {}]   ;;  %s1190_s4 = inlined_call_operand.vmem [shape: f32[1,49], index: 4, kind: input, shape index: {}]   ;;  %s1191_s5 = inlined_call_operand.vmem [shape: f32[1,49], index: 5, kind: input, shape index: {}]   ;;  %s1192_s6 = inlined_call_operand.hbm [shape: f32[16,49], index: 6, kind: output, shape index: {}]  }
   0x1   :  { %v940_v0 = vld [vmem:[%s1186_s0] sm:$0xff]  ;;  %843 = vset.pattern.permute.xlu1 %v892_v1  ;;  %842 = vset.pattern.permute.xlu0 %v892_v1  ;;  %v947_v5 = vld [vmem:[%s1186_s0 + $0x8] sm:$0xff] }
   0x2   :  { %v34_v2 = vand.u32 2147483647, %v940_v0  ;;  %v37_v3 = vand.u32 2139095040, %v940_v0  ;;  %v137_v7 = vand.u32 2147483647, %v947_v5  ;;  %v140_v8 = vand.u32 2139095040, %v947_v5 }
   0x4   :  { %v38_v4 = vshrl.u32 %v37_v3, 23  ;;  %v41_v6 = vand.u32 8388607, %v34_v2  ;;  %v141_v10 = vshrl.u32 %v140_v8, 23  ;;  %v955_v14 = vand.u32 8388607, %v137_v7 }
   0x6   :  { %v791_v9 = vadd.s32 4294967169, %v38_v4  ;;  %v42_v12 = vor.u32 8388608, %v41_v6  ;;  %v795_v13 = vadd.s32 4294967169, %v141_v10 }
   0x8   :  { %v44_v11 = vadd.s32 1, %v791_v9 }
   0xa   :  { %vm45_vm0 = vcmp.gt.s32.totalorder %v44_v11, 0 }
   0xb   :  { %11 = vsyncpa [#allocation3], 0  ;;  %v46_v15 = vsel %vm45_vm0, %v44_v11, 0  ;;  %v147_v16 = vadd.s32 1, %v795_v13  ;;  %v957_v19 = vshll.u32 %v42_v12, 8  ;;  %v145_v20 = vor.u32 8388608, %v955_v14 }
   0xc   :  { %v47_v17 = vshrl.u32 %v46_v15, 5  ;;  %v48_v18 = vand.u32 31, %v46_v15  ;;  %v893_v22 = vmov 683565275   ;;  %v894_v24 = vmov 2475754826  }
   0xd   :  { %vm148_vm1 = vcmp.gt.s32.totalorder %v147_v16, 0  ;;  %v895_v26 = vmov 2131351028   ;;  %v896_v28 = vmov 2102212464   ;;  %vm36_vm14 = vcmp.lt.s32.totalorder %v940_v0, 0 }
   0xe   :  { %v49_v21 = vsub.s32 32, %v48_v18  ;;  %v51_v23 = vshll.u32 %v893_v22, %v48_v18  ;;  %v54_v25 = vshll.u32 %v894_v24, %v48_v18  ;;  %v57_v27 = vshll.u32 %v895_v26, %v48_v18 }
   0xf   :  { %v60_v29 = vshll.u32 %v896_v28, %v48_v18  ;;  %v897_v30 = vmov 920167782   ;;  %vm66_vm2 = vcmp.lt.s32.totalorder %v47_v17, 1  ;;  %vm67_vm3 = vcmp.lt.s32.totalorder %v47_v17, 2 }
  0x10   :  { %v63_v31 = vshll.u32 %v897_v30, %v48_v18  ;;  %v50_v32 = vshrl.u32 %v893_v22, %v49_v21  ;;  %v52_v33 = vshrl.u32 %v894_v24, %v49_v21  ;;  %v55_v34 = vshrl.u32 %v895_v26, %v49_v21 }
  0x11   :  { %v58_v35 = vshrl.u32 %v896_v28, %v49_v21  ;;  %v61_v36 = vshrl.u32 %v897_v30, %v49_v21  ;;  %v898_v37 = vmov 1326507024   ;;  %vm68_vm4 = vcmp.lt.s32.totalorder %v47_v17, 3 }
  0x12   :  { %v64_v38 = vshrl.u32 %v898_v37, %v49_v21  ;;  %vm69_vm5 = vcmp.lt.s32.totalorder %v47_v17, 4  ;;  %v53_v39 = vor.u32 %v52_v33, %v51_v23  ;;  %v56_v40 = vor.u32 %v55_v34, %v54_v25 }
  0x13   :  { %v59_v41 = vor.u32 %v58_v35, %v57_v27  ;;  %v149_v42 = vsel %vm148_vm1, %v147_v16, 0  ;;  %v62_v43 = vor.u32 %v61_v36, %v60_v29  ;;  %v185_v23 = vshll.u32 %v145_v20, 8 }
  0x14   :  { %v65_v44 = vor.u32 %v64_v38, %v63_v31  ;;  %v150_v45 = vshrl.u32 %v149_v42, 5  ;;  %v151_v46 = vand.u32 31, %v149_v42  ;;  %v70_v47 = vsel %vm66_vm2, %v50_v32, %v53_v39 }
  0x15   :  { %v71_v48 = vsel %vm69_vm5, %v59_v41, 2102212464  ;;  %v74_v49 = vsel %vm66_vm2, %v53_v39, %v56_v40  ;;  %v78_v50 = vsel %vm66_vm2, %v56_v40, %v59_v41  ;;  %v75_v52 = vsel %vm69_vm5, %v62_v43, 920167782 }
  0x16   :  { %v72_v51 = vsel %vm68_vm4, %v56_v40, %v71_v48  ;;  %v79_v53 = vsel %vm69_vm5, %v65_v44, 1326507024  ;;  %v152_v54 = vsub.s32 32, %v151_v46  ;;  %v76_v56 = vsel %vm68_vm4, %v59_v41, %v75_v52 }
  0x17   :  { %v73_v55 = vsel %vm67_vm3, %v70_v47, %v72_v51  ;;  %v80_v57 = vsel %vm68_vm4, %v62_v43, %v79_v53  ;;  %v154_v58 = vshll.u32 %v893_v22, %v151_v46  ;;  %v77_v59 = vsel %vm67_vm3, %v74_v49, %v76_v56 }
  0x18   :  { %v81_v60 = vsel %vm67_vm3, %v78_v50, %v80_v57  ;;  %v89_v61 = vmul.u32 %v957_v19, %v73_v55  ;;  %v153_v62 = vshrl.u32 %v893_v22, %v152_v54  ;;  %v155_v6 = vshrl.u32 %v894_v24, %v152_v54 }
  0x19   :  { %v985_v63 = vmul.u32.u64.low %v957_v19, %v81_v60  ;;  %v986_v1 = vmul.u32.u64.high %v957_v19, %v81_v60, %v985_v63  ;;  %v989_v3 = vmul.u32.u64.low %v957_v19, %v77_v59  ;;  %v990_v4 = vmul.u32.u64.high %v957_v19, %v77_v59, %v989_v3 }
  0x1a   :  { %v157_v8 = vshll.u32 %v894_v24, %v151_v46  ;;  %v158_v9 = vshrl.u32 %v895_v26, %v152_v54  ;;  %v160_v10 = vshll.u32 %v895_v26, %v151_v46  ;;  %v161_v11 = vshrl.u32 %v896_v28, %v152_v54 }
  0x1b   :  { %v163_v12 = vshll.u32 %v896_v28, %v151_v46  ;;  %v164_v13 = vshrl.u32 %v897_v30, %v152_v54  ;;  %v166_v15 = vshll.u32 %v897_v30, %v151_v46  ;;  %v156_v16 = vor.u32 %v155_v6, %v154_v58 }
  0x1c   :  { %v159_v17 = vor.u32 %v158_v9, %v157_v8  ;;  %v167_v18 = vshrl.u32 %v898_v37, %v152_v54  ;;  %vm169_vm6 = vcmp.lt.s32.totalorder %v150_v45, 1  ;;  %vm91_vm7 = vc.u32 %v986_v1, %v989_v3 }
  0x1d   :  { %v92_v19 = vadd.s32 1, %v990_v4  ;;  %v162_v21 = vor.u32 %v161_v11, %v160_v10  ;;  %v165_v25 = vor.u32 %v164_v13, %v163_v12  ;;  %vm170_vm8 = vcmp.lt.s32.totalorder %v150_v45, 2 }
  0x1e   :  { %v168_v27 = vor.u32 %v167_v18, %v166_v15  ;;  %vm171_vm9 = vcmp.lt.s32.totalorder %v150_v45, 3  ;;  %vm172_vm10 = vcmp.lt.s32.totalorder %v150_v45, 4  ;;  %v173_v31 = vsel %vm169_vm6, %v153_v62, %v156_v16 }
  0x1f   :  { %v93_v29 = vsel %vm91_vm7, %v92_v19, %v990_v4  ;;  %v177_v32 = vsel %vm169_vm6, %v156_v16, %v159_v17  ;;  %v174_v34 = vsel %vm172_vm10, %v162_v21, 2102212464  ;;  %v178_v35 = vsel %vm172_vm10, %v165_v25, 920167782 }
  0x20   :  { %v94_v33 = vadd.s32 %v93_v29, %v89_v61  ;;  %v181_v36 = vsel %vm169_vm6, %v159_v17, %v162_v21  ;;  %v175_v38 = vsel %vm171_vm9, %v159_v17, %v174_v34  ;;  %v179_v39 = vsel %vm171_vm9, %v162_v21, %v178_v35 }
  0x21   :  { %v182_v14 = vsel %vm172_vm10, %v168_v27, 1326507024  ;;  %v180_v40 = vsel %vm170_vm8, %v177_v32, %v179_v39  ;;  %v176_v42 = vsel %vm170_vm8, %v173_v31, %v175_v38  ;;  %v90_v62 = vadd.s32 %v989_v3, %v986_v1 }
  0x22   :  { %v95_v20 = vadd.s32 536870912, %v94_v33  ;;  %v183_v41 = vsel %vm171_vm9, %v165_v25, %v182_v14  ;;  %v1012_v44 = vmul.u32.u64.low %v185_v23, %v180_v40  ;;  %v1013_v46 = vmul.u32.u64.high %v185_v23, %v180_v40, %v1012_v44 }
  0x23   :  { %v184_v43 = vsel %vm170_vm8, %v181_v36, %v183_v41  ;;  %v192_v51 = vmul.u32 %v185_v23, %v176_v42  ;;  %vm35_vm15 = vcmp.le.f32.partialorder %v34_v2, 0.7853982  ;;  %vm139_vm0 = vcmp.lt.s32.totalorder %v947_v5, 0 }
  0x24   :  { %v96_v47 = vshrl.u32 %v95_v20, 30  ;;  %v1015_v48 = vmul.u32.u64.low %v185_v23, %v184_v43  ;;  %v1016_v49 = vmul.u32.u64.high %v185_v23, %v184_v43, %v1015_v48  ;;  %v195_v52 = vadd.s32 1, %v1013_v46 }
  0x25   :  { %vm138_vm1 = vcmp.le.f32.partialorder %v137_v7, 0.7853982  ;;  %vm126_vm8 = vweird.f32 %v940_v0 }
  0x26   :  { %v97_v50 = vshll.u32 %v96_v47, 30  ;;  %vm194_vm11 = vc.u32 %v1016_v49, %v1012_v44  ;;  %v120_v25 = vsub.s32 4, %v96_v47  ;;  %v193_v1 = vadd.s32 %v1012_v44, %v1016_v49 }
  0x27   :  { %v196_v54 = vsel %vm194_vm11, %v195_v52, %v1013_v46 }
  0x28   :  { %v98_v53 = vsub.s32 %v94_v33, %v97_v50  ;;  %v197_v56 = vadd.s32 %v196_v54, %v192_v51  ;;  %v121_v34 = vsel %vm36_vm14, %v120_v25, %v96_v47 }
  0x29   :  { %v123_v14 = vsel %vm35_vm15, 0, %v121_v34  ;;  %v241_v34 = vlaneseq }
  0x2a   :  { %v100_v55 = vsub.s32 0, %v98_v53  ;;  %v198_v57 = vadd.s32 536870912, %v197_v56  ;;  %v351_v43 = vadd.s32 3, %v123_v14  ;;  %v127_v2 = vand.u32 3, %v123_v14 }
  0x2c   :  { %v792_v45 = vmin.u32 %v100_v55, %v98_v53  ;;  %v199_v59 = vshrl.u32 %v198_v57, 30  ;;  %v352_v49 = vand.u32 3, %v351_v43  ;;  %vm132_vm3 = vcmp.eq.s32.totalorder %v127_v2, 2 }
  0x2d   :  { %vm129_vm5 = vcmp.eq.s32.totalorder %v127_v2, 0  ;;  %vm128_vm7 = vcmp.lt.s32.totalorder %v127_v2, 2 }
  0x2e   :  { %v102_v58 = vclz %v792_v45  ;;  %v200_v61 = vshll.u32 %v199_v59, 30  ;;  %v223_v46 = vsub.s32 4, %v199_v59  ;;  %vm357_vm2 = vcmp.eq.s32.totalorder %v352_v49, 2 }
  0x2f   :  { %vm354_vm4 = vcmp.eq.s32.totalorder %v352_v49, 0  ;;  %vm353_vm6 = vcmp.lt.s32.totalorder %v352_v49, 2 }
  0x30   :  { %v793_v60 = vadd.s32 4294967294, %v102_v58  ;;  %v201_v4 = vsub.s32 %v197_v56, %v200_v61  ;;  %v224_v50 = vsel %vm139_vm0, %v223_v46, %v199_v59 }
  0x31   :  { %v226_v54 = vsel %vm138_vm1, 0, %v224_v50 }
  0x32   :  { %vm794_vm12 = vcmp.lt.s32.totalorder %v793_v60, 0  ;;  %v203_v10 = vsub.s32 0, %v201_v4  ;;  %v455_v58 = vadd.s32 3, %v226_v54 }
  0x33   :  { %v105_v63 = vsel %vm794_vm12, 0, %v793_v60 }
  0x34   :  { %v106_v6 = vsub.s32 32, %v105_v63  ;;  %v107_v8 = vshll.u32 %v98_v53, %v105_v63  ;;  %v110_v9 = vsub.s32 4294967266, %v105_v63  ;;  %v796_v13 = vmin.u32 %v203_v10, %v201_v4 }
  0x36   :  { %v108_v11 = vshrl.u32 %v90_v62, %v106_v6  ;;  %v111_v12 = vadd.s32 127, %v110_v9  ;;  %v205_v17 = vclz %v796_v13  ;;  %v456_v6 = vand.u32 3, %v455_v58 }
  0x38   :  { %v109_v15 = vor.u32 %v108_v11, %v107_v8  ;;  %v112_v16 = vshll.u32 %v111_v12, 23  ;;  %v797_v21 = vadd.s32 4294967294, %v205_v17  ;;  %v230_v8 = vand.u32 3, %v226_v54  ;;  %v27_v17 = vld [vmem:[%s1187_s1 + $0x8] sm:$0xff] }
  0x39   :  { %vm461_vm9 = vcmp.eq.s32.totalorder %v456_v6, 2  ;;  %vm458_vm11 = vcmp.eq.s32.totalorder %v456_v6, 0 }
  0x3a   :  { %v113_v18 = vor.u32 4788187, %v112_v16  ;;  %v116_v19 = vcvt.s32.f32 %v109_v15  ;;  %vm798_vm13 = vcmp.lt.s32.totalorder %v797_v21, 0  ;;  %vm235_vm10 = vcmp.eq.s32.totalorder %v230_v8, 2 }
  0x3b   :  { %v208_v27 = vsel %vm798_vm13, 0, %v797_v21  ;;  %vm232_vm12 = vcmp.eq.s32.totalorder %v230_v8, 0  ;;  %vm457_vm13 = vcmp.lt.s32.totalorder %v456_v6, 2 }
  0x3c   :  { %v114_v23 = vand.u32 2147483647, %v113_v18  ;;  %v209_v29 = vsub.s32 32, %v208_v27  ;;  %v210_v31 = vshll.u32 %v201_v4, %v208_v27  ;;  %v213_v32 = vsub.s32 4294967266, %v208_v27  ;;  %v26_v18 = vld [vmem:[%s1187_s1] sm:$0xff] }
  0x3d   :  { %v30_v27 = vld [vmem:[%s1189_s3] sm:$0xff] }
  0x3e   :  { %v117_v3 = vmul.f32 %v116_v19, %v114_v23  ;;  %v211_v35 = vshrl.u32 %v193_v1, %v209_v29  ;;  %v214_v36 = vadd.s32 127, %v213_v32  ;;  %v528_v1 = vmul.f32 6.2831855, %v27_v17  ;;  %v29_v29 = vld [vmem:[%s1188_s2 + $0x8] sm:$0xff] }
  0x3f   :  { %v508_v32 = vmul.f32 %v29_v29, %v29_v29 }
  0x40   :  { %v118_v33 = vxor.u32 2147483648, %v117_v3  ;;  %v212_v20 = vor.u32 %v211_v35, %v210_v31  ;;  %v215_v40 = vshll.u32 %v214_v36, 23  ;;  %v28_v31 = vld [vmem:[%s1188_s2] sm:$0xff]  ;;  %v242_v35 = vshrl.u32 %v241_v34, 7  ;;  %s899_s2 = smov [#allocation2]  }
  0x41   :  { %v32_v36 = vld [vmem:[%s1190_s4] sm:$0x1]  ;;  %s780_s4 = sshll.u32 %s899_s2, 4  ;;  %s781_s4 = int_to_ptr.vmem [resolvable:$true] %s780_s4 }
  0x42   :  { %v119_v38 = vsel %vm36_vm14, %v118_v33, %v117_v3  ;;  %v216_v41 = vor.u32 4788187, %v215_v40  ;;  %v219_v42 = vcvt.s32.f32 %v212_v20  ;;  %vm231_vm14 = vcmp.lt.s32.totalorder %v230_v8, 2  ;;  %v31_v3 = vld [vmem:[%s1189_s3 + $0x8] sm:$0xff]  ;;  %v807_v40 = vld [vmem:[%s1191_s5] ss:$0 sm:$0xff]  ;;  %p873_p1 = scmp.lt.s32.totalorder %s781_s4, %s781_s4 }
  0x43   :  { %v122_v39 = vsel %vm35_vm15, %v940_v0, %v119_v38  ;;  %vm229_vm15 = vweird.f32 %v947_v5  ;;  %v507_v33 = vmul.f32 %v28_v31, %v28_v31  ;;  %v243_v38 = vsub.s32 0, %v242_v35  ;;  %s868_s5 = scalar_lea.vmem %s781_s4, 256 }
  0x44   :  { %844 = vcosq.f32 %v122_v39  ;;  %v217_v44 = vand.u32 2147483647, %v216_v41  ;;  %p869_p0 = scmp.ne.s32.totalorder %s781_s4, %s868_s5  ;;  %p874_p2 = scmp.lt.s32.totalorder %s868_s5, %s868_s5 }
  0x45   :  { %846 = vsinq.f32 %v122_v39  ;;  %v486_v39 = vsub.f32 0.0, %v32_v36  ;;  %v244_v20 = vrot.slane %v32_v36, %v243_v38 }
  0x46   :  { %v220_v48 = vmul.f32 %v219_v42, %v217_v44  ;;  %p875_p3 = por %p874_p2, %p873_p1 }
  0x47   :  { %v491_v14 = vrot.slane %v486_v39, %v243_v38 }
  0x48   :  { %v221_v47 = vxor.u32 2147483648, %v220_v48  ;;  %p876_p4 = pnand %p875_p3, %p869_p0 }
  0x4a   :  { %v222_v51 = vsel %vm139_vm0, %v221_v47, %v220_v48 }
  0x4b   :  { %v225_v53 = vsel %vm138_vm1, %v947_v5, %v222_v51  ;;  %v527_v5 = vmul.f32 6.2831855, %v26_v18 }
  0x4c   :  { %848 = vcosq.f32 %v225_v53 }
  0x4d   :  { %850 = vsinq.f32 %v225_v53 }
  0x4e   :  { %v845_v52 = vpop.eup %844 }
  0x4f   :  { %v847_v55 = vpop.eup %846  ;;  %v133_v56 = vxor.u32 2147483648, %v845_v52 }
  0x50   :  { %v130_v45 = vxor.u32 2147483648, %v847_v55 }
  0x51   :  { %v359_v7 = vsel %vm357_vm2, %v133_v56, %v847_v55  ;;  %v134_v57 = vsel %vm132_vm3, %v133_v56, %v847_v55 }
  0x52   :  { %v356_v59 = vsel %vm354_vm4, %v845_v52, %v130_v45  ;;  %v131_v60 = vsel %vm129_vm5, %v845_v52, %v130_v45 }
  0x53   :  { %v360_v61 = vsel %vm353_vm6, %v356_v59, %v359_v7  ;;  %v135_v62 = vsel %vm128_vm7, %v131_v60, %v134_v57 }
  0x54   :  { %v361_v63 = vsel %vm126_vm8, nan, %v360_v61  ;;  %v136_v4 = vsel %vm126_vm8, nan, %v135_v62 }
  0x55   :  { %474 = vperm.xlu1 %843, %v361_v63   ;;  %248 = vperm.xlu0 %842, %v136_v4  }
  0x56   :  { %v849_v9 = vpop.eup %848 }
  0x57   :  { %v851_v10 = vpop.eup %850  ;;  %v236_v11 = vxor.u32 2147483648, %v849_v9 }
  0x58   :  { %v233_v0 = vxor.u32 2147483648, %v851_v10 }
  0x59   :  { %v463_v12 = vsel %vm461_vm9, %v236_v11, %v851_v10  ;;  %v237_v13 = vsel %vm235_vm10, %v236_v11, %v851_v10 }
  0x5a   :  { %v460_v15 = vsel %vm458_vm11, %v849_v9, %v233_v0  ;;  %v234_v16 = vsel %vm232_vm12, %v849_v9, %v233_v0 }
  0x5b   :  { %v464_v19 = vsel %vm457_vm13, %v460_v15, %v463_v12  ;;  %v238_v21 = vsel %vm231_vm14, %v234_v16, %v237_v13 }
  0x5c   :  { %v465_v23 = vsel %vm229_vm15, nan, %v464_v19  ;;  %v239_v25 = vsel %vm229_vm15, nan, %v238_v21 }
  0x5d   :  { %479 = vperm.xlu1 %843, %v465_v23   ;;  %253 = vperm.xlu0 %842, %v239_v25  }
  0x61   :  { %536 = vperm.xlu1 %843, %v528_v1   ;;  %531 = vperm.xlu0 %842, %v527_v5  }
  0x65   :  { %548 = vperm.xlu1 %843, %v31_v3   ;;  %543 = vperm.xlu0 %842, %v30_v27  }
  0x69   :  { %516 = vperm.xlu1 %843, %v508_v32   ;;  %511 = vperm.xlu0 %842, %v507_v33  }
  0xd4   :  { %v475_v41 = vpop.permute.xlu1 %474  ;;  %v249_v42 = vpop.permute.xlu0 %248 }
  0xd5   :  { %v482_v43 = vmul.f32 %v807_v40, %v475_v41  ;;  %v493_v44 = vmul.f32 %v491_v14, %v475_v41  ;;  %v256_v46 = vmul.f32 %v249_v42, %v244_v20  ;;  %v495_v48 = vmul.f32 %v807_v40, %v249_v42 }
  0xd7   :  { %v497_v49 = vadd.f32 %v495_v48, %v493_v44  ;;  %v484_v2 = vadd.f32 %v482_v43, %v256_v46 }
  0xd9   :  { %v501_v47 = vmul.f32 %v497_v49, %v497_v49  ;;  %v499_v50 = vmul.f32 %v484_v2, %v484_v2 }
  0xdb   :  { %v1057_v51 = vadd.f32 %v501_v47, %v499_v50 }
  0xdc   :  { %v480_v52 = vpop.permute.xlu1 %479  ;;  %v254_v53 = vpop.permute.xlu0 %253 }
  0xdd   :  { %v483_v54 = vmul.f32 %v807_v40, %v480_v52  ;;  %v494_v55 = vmul.f32 %v491_v14, %v480_v52  ;;  %v257_v56 = vmul.f32 %v254_v53, %v244_v20  ;;  %v496_v45 = vmul.f32 %v807_v40, %v254_v53 }
  0xdf   :  { %v498_v7 = vadd.f32 %v496_v45, %v494_v55  ;;  %v485_v57 = vadd.f32 %v483_v54, %v257_v56 }
  0xe0   :  { %v537_v58 = vpop.permute.xlu1 %536  ;;  %v532_v59 = vpop.permute.xlu0 %531 }
  0xe1   :  { %v502_v60 = vmul.f32 %v498_v7, %v498_v7  ;;  %v500_v61 = vmul.f32 %v485_v57, %v485_v57  ;;  %v540_v63 = vmul.f32 %v537_v58, %v485_v57  ;;  %v539_v4 = vmul.f32 %v532_v59, %v484_v2 }
  0xe3   :  { %v1059_v62 = vadd.f32 %v502_v60, %v500_v61 }
  0xe4   :  { %v549_v6 = vpop.permute.xlu1 %548  ;;  %v544_v8 = vpop.permute.xlu0 %543 }
  0xe5   :  { %v1061_v9 = vadd.f32 %v549_v6, %v540_v63  ;;  %v1063_v10 = vadd.f32 %v544_v8, %v539_v4 }
  0xe7   :  { %v656_v11 = vand.u32 2147483647, %v1061_v9  ;;  %v659_v0 = vand.u32 2139095040, %v1061_v9  ;;  %v556_v12 = vand.u32 2139095040, %v1063_v10  ;;  %v553_v16 = vand.u32 2147483647, %v1063_v10 }
  0xe8   :  { %vm658_vm14 = vcmp.lt.s32.totalorder %v1061_v9, 0 }
  0xe9   :  { %v660_v13 = vshrl.u32 %v659_v0, 23  ;;  %v663_v15 = vand.u32 8388607, %v656_v11  ;;  %v557_v17 = vshrl.u32 %v556_v12, 23  ;;  %v560_v25 = vand.u32 8388607, %v553_v16 }
  0xea   :  { %vm1142_vm15 = vcmp.le.f32.partialorder %v656_v11, 0.7853982  ;;  %v505_v11 = vmul.f32 -0.5, %v1057_v51 }
  0xeb   :  { %v812_v18 = vadd.s32 4294967169, %v660_v13  ;;  %v808_v19 = vadd.s32 4294967169, %v557_v17  ;;  %v664_v23 = vor.u32 8388608, %v663_v15  ;;  %v561_v32 = vor.u32 8388608, %v560_v25 }
  0xed   :  { %v666_v21 = vadd.s32 1, %v812_v18  ;;  %v563_v1 = vadd.s32 1, %v808_v19  ;;  %v1073_v31 = vshll.u32 %v664_v23, 8 }
  0xef   :  { %vm667_vm0 = vcmp.gt.s32.totalorder %v666_v21, 0  ;;  %vm564_vm1 = vcmp.gt.s32.totalorder %v563_v1, 0 }
  0xf0   :  { %v668_v5 = vsel %vm667_vm0, %v666_v21, 0  ;;  %v565_v29 = vsel %vm564_vm1, %v563_v1, 0  ;;  %vm555_vm0 = vcmp.lt.s32.totalorder %v1063_v10, 0  ;;  %vm1157_vm1 = vcmp.le.f32.partialorder %v553_v16, 0.7853982 }
  0xf1   :  { %v669_v3 = vshrl.u32 %v668_v5, 5  ;;  %v670_v27 = vand.u32 31, %v668_v5  ;;  %v1076_v35 = vshrl.u32 %v565_v29, 5  ;;  %v567_v36 = vand.u32 31, %v565_v29 }
  0xf2   :  { %v601_v5 = vshll.u32 %v561_v32, 8 }
  0xf3   :  { %v671_v33 = vsub.s32 32, %v670_v27  ;;  %v673_v34 = vshll.u32 %v893_v22, %v670_v27  ;;  %v676_v38 = vshll.u32 %v894_v24, %v670_v27  ;;  %v679_v39 = vshll.u32 %v895_v26, %v670_v27 }
  0xf4   :  { %v682_v14 = vshll.u32 %v896_v28, %v670_v27  ;;  %v685_v20 = vshll.u32 %v897_v30, %v670_v27  ;;  %vm688_vm2 = vcmp.lt.s32.totalorder %v669_v3, 1  ;;  %vm689_vm3 = vcmp.lt.s32.totalorder %v669_v3, 2 }
  0xf5   :  { %v674_v40 = vshrl.u32 %v894_v24, %v671_v33  ;;  %v677_v41 = vshrl.u32 %v895_v26, %v671_v33  ;;  %v680_v42 = vshrl.u32 %v896_v28, %v671_v33  ;;  %v672_v43 = vshrl.u32 %v893_v22, %v671_v33 }
  0xf6   :  { %v683_v44 = vshrl.u32 %v897_v30, %v671_v33  ;;  %v686_v46 = vshrl.u32 %v898_v37, %v671_v33  ;;  %v568_v47 = vsub.s32 32, %v567_v36  ;;  %vm690_vm4 = vcmp.lt.s32.totalorder %v669_v3, 3 }
  0xf7   :  { %v675_v48 = vor.u32 %v674_v40, %v673_v34  ;;  %v678_v49 = vor.u32 %v677_v41, %v676_v38  ;;  %v681_v2 = vor.u32 %v680_v42, %v679_v39  ;;  %vm691_vm5 = vcmp.lt.s32.totalorder %v669_v3, 4 }
  0xf8   :  { %v684_v50 = vor.u32 %v683_v44, %v682_v14  ;;  %v687_v52 = vor.u32 %v686_v46, %v685_v20  ;;  %v570_v58 = vshll.u32 %v893_v22, %v567_v36  ;;  %v571_v61 = vshrl.u32 %v894_v24, %v568_v47 }
  0xf9   :  { %v692_v53 = vsel %vm688_vm2, %v672_v43, %v675_v48  ;;  %v693_v54 = vsel %vm691_vm5, %v681_v2, 2102212464  ;;  %v696_v55 = vsel %vm688_vm2, %v675_v48, %v678_v49  ;;  %v700_v56 = vsel %vm688_vm2, %v678_v49, %v681_v2 }
  0xfa   :  { %v694_v45 = vsel %vm690_vm4, %v678_v49, %v693_v54  ;;  %v697_v7 = vsel %vm691_vm5, %v684_v50, 920167782  ;;  %v701_v57 = vsel %vm691_vm5, %v687_v52, 1326507024  ;;  %v573_v63 = vshll.u32 %v894_v24, %v567_v36 }
  0xfb   :  { %v698_v59 = vsel %vm690_vm4, %v681_v2, %v697_v7  ;;  %v702_v60 = vsel %vm690_vm4, %v684_v50, %v701_v57  ;;  %v695_v4 = vsel %vm689_vm3, %v692_v53, %v694_v45  ;;  %v574_v0 = vshrl.u32 %v895_v26, %v568_v47 }
  0xfc   :  { %v699_v6 = vsel %vm689_vm3, %v696_v55, %v698_v59  ;;  %v703_v8 = vsel %vm689_vm3, %v700_v56, %v702_v60  ;;  %v572_v18 = vor.u32 %v571_v61, %v570_v58  ;;  %v576_v24 = vshll.u32 %v895_v26, %v567_v36 }
  0xfd   :  { %v1099_v12 = vmul.u32.u64.low %v1073_v31, %v703_v8  ;;  %v1100_v13 = vmul.u32.u64.high %v1073_v31, %v703_v8, %v1099_v12  ;;  %v1103_v15 = vmul.u32.u64.low %v1073_v31, %v699_v6  ;;  %v1104_v17 = vmul.u32.u64.high %v1073_v31, %v699_v6, %v1103_v15 }
  0xfe   :  { %v575_v19 = vor.u32 %v574_v0, %v573_v63  ;;  %v577_v21 = vshrl.u32 %v896_v28, %v568_v47  ;;  %v579_v23 = vshll.u32 %v896_v28, %v567_v36  ;;  %v580_v25 = vshrl.u32 %v897_v30, %v568_v47  ;;  %v517_v63 = vpop.permute.xlu1 %516 }
  0xff   :  { %v583_v1 = vshrl.u32 %v898_v37, %v568_v47  ;;  %v711_v3 = vmul.u32 %v1073_v31, %v695_v4  ;;  %v569_v27 = vshrl.u32 %v893_v22, %v568_v47  ;;  %v582_v33 = vshll.u32 %v897_v30, %v567_v36 }
 0x100   :  { %v578_v29 = vor.u32 %v577_v21, %v576_v24  ;;  %vm713_vm6 = vc.u32 %v1100_v13, %v1103_v15  ;;  %v714_v26 = vadd.s32 1, %v1104_v17  ;;  %v581_v34 = vor.u32 %v580_v25, %v579_v23 }
 0x101   :  { %vm585_vm7 = vcmp.lt.s32.totalorder %v1076_v35, 1  ;;  %v584_v28 = vor.u32 %v583_v1, %v582_v33  ;;  %vm587_vm8 = vcmp.lt.s32.totalorder %v1076_v35, 3  ;;  %vm588_vm9 = vcmp.lt.s32.totalorder %v1076_v35, 4 }
 0x102   :  { %v593_v37 = vsel %vm585_vm7, %v572_v18, %v575_v19  ;;  %v715_v31 = vsel %vm713_vm6, %v714_v26, %v1104_v17  ;;  %v590_v32 = vsel %vm588_vm9, %v578_v29, 2102212464  ;;  %v594_v22 = vsel %vm588_vm9, %v581_v34, 920167782 }
 0x103   :  { %v597_v38 = vsel %vm585_vm7, %v575_v19, %v578_v29  ;;  %v716_v39 = vadd.s32 %v715_v31, %v711_v3  ;;  %vm586_vm10 = vcmp.lt.s32.totalorder %v1076_v35, 2  ;;  %v595_v30 = vsel %vm587_vm8, %v578_v29, %v594_v22  ;;  %v512_v3 = vpop.permute.xlu0 %511 }
 0x104   :  { %v598_v36 = vsel %vm588_vm9, %v584_v28, 1326507024  ;;  %v589_v14 = vsel %vm585_vm7, %v569_v27, %v572_v18  ;;  %v591_v20 = vsel %vm587_vm8, %v575_v19, %v590_v32  ;;  %v596_v40 = vsel %vm586_vm10, %v593_v37, %v595_v30 }
 0x105   :  { %v599_v41 = vsel %vm587_vm8, %v581_v34, %v598_v36  ;;  %v717_v42 = vadd.s32 536870912, %v716_v39  ;;  %v1121_v44 = vmul.u32.u64.low %v601_v5, %v596_v40  ;;  %v1122_v46 = vmul.u32.u64.high %v601_v5, %v596_v40, %v1121_v44 }
 0x106   :  { %v600_v43 = vsel %vm586_vm10, %v597_v38, %v599_v41  ;;  %v592_v47 = vsel %vm586_vm10, %v589_v14, %v591_v20  ;;  %v712_v8 = vadd.s32 %v1103_v15, %v1100_v13  ;;  %852 = vrcp.f32 %v517_v63 }
 0x107   :  { %v1124_v48 = vmul.u32.u64.low %v601_v5, %v600_v43  ;;  %v1125_v49 = vmul.u32.u64.high %v601_v5, %v600_v43, %v1124_v48  ;;  %v1127_v2 = vshrl.u32 %v717_v42, 30  ;;  %v611_v35 = vadd.s32 1, %v1122_v46 }
 0x108   :  { %v608_v52 = vmul.u32 %v601_v5, %v592_v47  ;;  %854 = vrcp.f32 %v512_v3  ;;  %v506_v22 = vmul.f32 -0.5, %v1059_v62  ;;  %vm748_vm5 = vweird.f32 %v1061_v9 }
 0x109   :  { %v719_v50 = vshll.u32 %v1127_v2, 30  ;;  %vm610_vm11 = vc.u32 %v1125_v49, %v1121_v44  ;;  %v609_v26 = vadd.s32 %v1121_v44, %v1125_v49  ;;  %v742_v40 = vsub.s32 4, %v1127_v2 }
 0x10a   :  { %v612_v54 = vsel %vm610_vm11, %v611_v35, %v1122_v46  ;;  %vm761_vm6 = vcmask 400384   ;;  %vm645_vm10 = vweird.f32 %v1063_v10 }
 0x10b   :  { %v720_v53 = vsub.s32 %v716_v39, %v719_v50  ;;  %v613_v55 = vadd.s32 %v612_v54, %v608_v52  ;;  %v743_v46 = vsel %vm658_vm14, %v742_v40, %v1127_v2 }
 0x10c   :  { %v745_v50 = vsel %vm1142_vm15, 0, %v743_v46 }
 0x10d   :  { %v722_v56 = vsub.s32 0, %v720_v53  ;;  %v614_v45 = vadd.s32 536870912, %v613_v55  ;;  %v749_v54 = vand.u32 3, %v745_v50 }
 0x10f   :  { %v813_v7 = vmin.u32 %v722_v56, %v720_v53  ;;  %v1133_v57 = vshrl.u32 %v614_v45, 30  ;;  %vm754_vm2 = vcmp.eq.s32.totalorder %v749_v54, 2  ;;  %vm751_vm3 = vcmp.eq.s32.totalorder %v749_v54, 0 }
 0x110   :  { %v853_v28 = vpop.eup %852  ;;  %vm750_vm4 = vcmp.lt.s32.totalorder %v749_v54, 2 }
 0x111   :  { %v724_v58 = vclz %v813_v7  ;;  %v616_v59 = vshll.u32 %v1133_v57, 30  ;;  %v522_v14 = vmul.f32 %v853_v28, %v506_v22  ;;  %v639_v2 = vsub.s32 4, %v1133_v57 }
 0x112   :  { %v855_v49 = vpop.eup %854 }
 0x113   :  { %v814_v60 = vadd.s32 4294967294, %v724_v58  ;;  %v617_v61 = vsub.s32 %v613_v55, %v616_v59  ;;  %v525_v44 = vmul.f32 1.442695, %v522_v14  ;;  %v520_v52 = vmul.f32 %v855_v49, %v505_v11 }
 0x114   :  { %v640_v58 = vsel %vm555_vm0, %v639_v2, %v1133_v57 }
 0x115   :  { %vm815_vm12 = vcmp.lt.s32.totalorder %v814_v60, 0  ;;  %v619_v6 = vsub.s32 0, %v617_v61  ;;  %v523_v45 = vmul.f32 1.442695, %v520_v52 }
 0x116   :  { %v727_v4 = vsel %vm815_vm12, 0, %v814_v60 }
 0x117   :  { %v728_v0 = vsub.s32 32, %v727_v4  ;;  %v732_v12 = vsub.s32 4294967266, %v727_v4  ;;  %v809_v17 = vmin.u32 %v619_v6, %v617_v61  ;;  %v729_v18 = vshll.u32 %v720_v53, %v727_v4 }
 0x119   :  { %v730_v19 = vshrl.u32 %v712_v8, %v728_v0  ;;  %v733_v24 = vadd.s32 127, %v732_v12  ;;  %v621_v21 = vclz %v809_v17 }
 0x11b   :  { %v731_v23 = vor.u32 %v730_v19, %v729_v18  ;;  %v734_v25 = vshll.u32 %v733_v24, 23  ;;  %v810_v1 = vadd.s32 4294967294, %v621_v21 }
 0x11d   :  { %v735_v5 = vor.u32 4788187, %v734_v25  ;;  %vm811_vm13 = vcmp.lt.s32.totalorder %v810_v1, 0  ;;  %v738_v29 = vcvt.s32.f32 %v731_v23 }
 0x11e   :  { %v624_v33 = vsel %vm811_vm13, 0, %v810_v1 }
 0x11f   :  { %v736_v27 = vand.u32 2147483647, %v735_v5  ;;  %v625_v13 = vsub.s32 32, %v624_v33  ;;  %v629_v15 = vsub.s32 4294967266, %v624_v33  ;;  %v626_v37 = vshll.u32 %v617_v61, %v624_v33 }
 0x120   :  { %v642_v61 = vsel %vm1157_vm1, 0, %v640_v58 }
 0x121   :  { %v739_v34 = vmul.f32 %v738_v29, %v736_v27  ;;  %v627_v31 = vshrl.u32 %v609_v26, %v625_v13  ;;  %v630_v32 = vadd.s32 127, %v629_v15  ;;  %v646_v0 = vand.u32 3, %v642_v61 }
 0x123   :  { %v740_v38 = vxor.u32 2147483648, %v739_v34  ;;  %v628_v39 = vor.u32 %v627_v31, %v626_v37  ;;  %v631_v30 = vshll.u32 %v630_v32, 23  ;;  %vm651_vm7 = vcmp.eq.s32.totalorder %v646_v0, 2 }
 0x124   :  { %vm648_vm8 = vcmp.eq.s32.totalorder %v646_v0, 0  ;;  %vm647_vm9 = vcmp.lt.s32.totalorder %v646_v0, 2 }
 0x125   :  { %v741_v36 = vsel %vm658_vm14, %v740_v38, %v739_v34  ;;  %v632_v41 = vor.u32 4788187, %v631_v30  ;;  %v635_v43 = vcvt.s32.f32 %v628_v39 }
 0x126   :  { %v744_v62 = vsel %vm1142_vm15, %v1061_v9, %v741_v36 }
 0x127   :  { %856 = vcosq.f32 %v744_v62  ;;  %v633_v42 = vand.u32 2147483647, %v632_v41 }
 0x128   :  { %858 = vsinq.f32 %v744_v62 }
 0x129   :  { %v636_v48 = vmul.f32 %v635_v43, %v633_v42  ;;  %860 = vpow2.f32 %v525_v44 }
 0x12b   :  { %v637_v47 = vxor.u32 2147483648, %v636_v48 }
 0x12d   :  { %v638_v35 = vsel %vm555_vm0, %v637_v47, %v636_v48 }
 0x12e   :  { %v641_v51 = vsel %vm1157_vm1, %v1063_v10, %v638_v35 }
 0x12f   :  { %862 = vcosq.f32 %v641_v51 }
 0x130   :  { %864 = vsinq.f32 %v641_v51 }
 0x131   :  { %v857_v55 = vpop.eup %856  ;;  %866 = vpow2.f32 %v523_v45 }
 0x132   :  { %v859_v56 = vpop.eup %858  ;;  %v755_v7 = vxor.u32 2147483648, %v857_v55 }
 0x133   :  { %v752_v59 = vxor.u32 2147483648, %v859_v56  ;;  %v861_v4 = vpop.eup %860 }
 0x134   :  { %v756_v16 = vsel %vm754_vm2, %v755_v7, %v859_v56 }
 0x135   :  { %v753_v60 = vsel %vm751_vm3, %v857_v55, %v752_v59 }
 0x136   :  { %v757_v63 = vsel %vm750_vm4, %v753_v60, %v756_v16 }
 0x137   :  { %v758_v6 = vsel %vm748_vm5, nan, %v757_v63 }
 0x138   :  { %v760_v8 = vmul.f32 %v861_v4, %v758_v6 }
 0x139   :  { %v863_v12 = vpop.eup %862 }
 0x13a   :  { %v765_v57 = vsel %vm761_vm6, %v760_v8, 0.0  ;;  %v865_v17 = vpop.eup %864  ;;  %v652_v18 = vxor.u32 2147483648, %v863_v12 }
 0x13b   :  { %766 = vadd.xlane.f32.xlu1 %v765_v57  ;;  %v649_v19 = vxor.u32 2147483648, %v865_v17  ;;  %v867_v23 = vpop.eup %866 }
 0x13c   :  { %v653_v24 = vsel %vm651_vm7, %v652_v18, %v865_v17 }
 0x13d   :  { %v650_v21 = vsel %vm648_vm8, %v863_v12, %v649_v19 }
 0x13e   :  { %v654_v9 = vsel %vm647_vm9, %v650_v21, %v653_v24 }
 0x13f   :  { %v655_v25 = vsel %vm645_vm10, nan, %v654_v9 }
 0x140   :  { %v759_v1 = vmul.f32 %v867_v23, %v655_v25 }
 0x142   :  { %v762_v5 = vsel %vm761_vm6, %v759_v1, 0.0 }
 0x143   :  { %763 = vadd.xlane.f32.xlu0 %v762_v5 }
 0x1c8   :  { %v767_v3 = vpop.xlane.xlu1 %766 }
 0x1c9   :  { %v770_v27 = vmul.f32 0.020408163, %v767_v3 }
 0x1cb   :  { %v772_v29 = vsub.f32 %v760_v8, %v770_v27 }
 0x1cd   :  { %774 = vst.msk [vmem:[#allocation2 + $0x8] sm:$0xff] %vm761_vm6, %v772_v29 }
 0x1d0   :  { %v764_v33 = vpop.xlane.xlu0 %763 }
 0x1d1   :  { %v769_v26 = vmul.f32 0.020408163, %v764_v33 }
 0x1d3   :  { %v771_v13 = vsub.f32 %v759_v1, %v769_v26 }
 0x1d5   :  { %773 = vst.msk [vmem:[#allocation2] sm:$0xff] %vm761_vm6, %v771_v13 }
 0x1d6   :  { %879 = shalt.err (!%p876_p4)
}
 0x1d7   :  { %s880_s16 = scalar_lea.hbm %s1192_s6, 256 }
 0x1d8   :  { %p881_p5 = scmp.ne.s32.totalorder %s1192_s6, %s880_s16  ;;  %p884_p6 = scmp.lt.u32.totalorder %s880_s16, %s1192_s6 }
 0x1da   :  { %p886_p7 = pnand %p884_p6, %p881_p5 }
 0x1dc   :  { %889 = shalt.err (!%p886_p7)
}
 0x1dd   :  { %s900_s21 = smov 128   ;;  %s901_s22 = smov 8  }
 0x1de   :  { %786 = dma.vmem_to_hbm [thread:$0]  %s781_s4, 256, %s1192_s6, [#allocation3], %s900_s21, %s900_s21, %s901_s22  }
 0x1df   :  { %890 = dma.done.wait [#allocation3], 256  }
 0x1e0   :  { %891 = vsyncadd [#allocation3], 4294967040 }
 0x1e1   :  { %790 = vsyncpa [#allocation3], 1 }

</bundles_post_ra>
